<compile_context>
chip_gen: v7x
topology: tpu7x:2x2x1
jax: 0.10.0
libtpu: 0.0.40
codegen_flags: <defaults>
</compile_context>

<pallas_src>
import functools

import numpy as np
import jax
import jax.numpy as jnp
from jax.experimental import pallas as pl
from jax.experimental.pallas import tpu as pltpu


def _gaussian_taps_1d(kernel_size: int, sigma: float) -> np.ndarray:
    # The module's 2D kernel exp(-(x^2+y^2)/(2*s^2))/Z factors exactly into
    # outer(g, g) with g = exp(-x^2/(2*s^2)) / sum(exp(-x^2/(2*s^2))).
    coords = np.linspace(-1.0, 1.0, kernel_size)
    g = np.exp(-(coords ** 2) / (2.0 * sigma ** 2))
    return g / g.sum()


def _gaussian_kernel_2d(kernel_size: int, sigma: float) -> np.ndarray:
    # Mirrors the torch module's construction (for the pure-JAX reference).
    coords = np.linspace(-1.0, 1.0, kernel_size)
    k = np.exp(-(coords[None, :] ** 2 + coords[:, None] ** 2) / (2.0 * sigma ** 2))
    return (k / k.sum()).astype(np.float32)


def _blur_kernel(x_ref, out_ref, xpad_ref, *, taps, p, H, W):
    # x_ref   : (1, H, W)   one (n, c) image, W in the lane dimension
    # out_ref : (1, H, W)
    # xpad_ref: (H+2p, W+2p) f32 VMEM scratch holding the reflect-padded tile
    ksize = len(taps)

    # --- build reflect padding in VMEM (never materialized in HBM) ----------
    xpad_ref[p:p + H, p:p + W] = x_ref[0].astype(jnp.float32)
    for k in range(p):
        # reflected columns (left / right); corners handled by the row pass
        xpad_ref[p:p + H, k:k + 1] = xpad_ref[p:p + H, 2 * p - k:2 * p - k + 1]
        xpad_ref[p:p + H, p + W + k:p + W + k + 1] = (
            xpad_ref[p:p + H, p + W - 2 - k:p + W - 1 - k])
    for k in range(p):
        # reflected rows (top / bottom), copied from already column-padded rows
        xpad_ref[k:k + 1, :] = xpad_ref[2 * p - k:2 * p - k + 1, :]
        xpad_ref[p + H + k:p + H + k + 1, :] = (
            xpad_ref[p + H - 2 - k:p + H - 1 - k, :])

    # --- separable convolution ----------------------------------------------
    # Horizontal 1D pass over all H+2p rows; slices stream from the scratch Ref.
    h = taps[0] * xpad_ref[:, 0:W]
    for kj in range(1, ksize):
        h = h + taps[kj] * xpad_ref[:, kj:kj + W]
    # Vertical 1D pass.
    acc = taps[0] * h[0:H, :]
    for ki in range(1, ksize):
        acc = acc + taps[ki] * h[ki:ki + H, :]

    out_ref[0] = acc.astype(out_ref.dtype)


def gaussian_blur(x_nchw: jax.Array, kernel_size: int, sigma: float) -> jax.Array:
    N, C, H, W = x_nchw.shape
    assert kernel_size % 2 == 1, "only odd kernel sizes keep an HxW output"
    p = kernel_size // 2
    assert p < H and p < W, "reflect padding requires padding < spatial size"
    taps = tuple(float(t) for t in _gaussian_taps_1d(kernel_size, sigma))

    # Free metadata reshape: channels go to the grid, W stays in lanes.
    x_flat = x_nchw.reshape(N * C, H, W)

    # TODO(synk): for large images, tile H with a +/-p halo (and raise
    # vmem_limit_bytes) so double-buffered blocks stay within v7x's 64 MiB VMEM.
    out_flat = pl.pallas_call(
        functools.partial(_blur_kernel, taps=taps, p=p, H=H, W=W),
        out_shape=jax.ShapeDtypeStruct((N * C, H, W), x_nchw.dtype),
        grid=(N * C,),
        in_specs=[pl.BlockSpec((1, H, W), lambda i: (i, 0, 0))],
        out_specs=pl.BlockSpec((1, H, W), lambda i: (i, 0, 0)),
        scratch_shapes=[pltpu.VMEM((H + 2 * p, W + 2 * p), jnp.float32)],
        compiler_params=pltpu.CompilerParams(dimension_semantics=("parallel",)),
    )(x_flat)
    return out_flat.reshape(N, C, H, W)


def _reference(x_nchw: jax.Array, kernel_size: int, sigma: float) -> jax.Array:
    # Pure-JAX reference: same math as F.conv2d depthwise on reflect-padded input.
    N, C, H, W = x_nchw.shape
    p = kernel_size // 2
    w = jnp.asarray(_gaussian_kernel_2d(kernel_size, sigma))
    xpad = jnp.pad(x_nchw, ((0, 0), (0, 0), (p, p), (p, p)), mode="reflect")
    out = jnp.zeros((N, C, H, W), jnp.float32)
    for ki in range(kernel_size):
        for kj in range(kernel_size):
            out = out + w[ki, kj] * xpad[:, :, ki:ki + H, kj:kj + W].astype(jnp.float32)
    return out.astype(x_nchw.dtype)


if __name__ == "__main__":
    kernel_size = 5
    channels = 4
    sigma = 1.5

    key = jax.random.PRNGKey(0)
    x = jax.random.normal(key, (2, channels, 16, 16), dtype=jnp.float32)

    out = jax.block_until_ready(gaussian_blur(x, kernel_size, sigma))
    ref = jax.block_until_ready(_reference(x, kernel_size, sigma))

    assert out.shape == x.shape, (out.shape, x.shape)
    np.testing.assert_allclose(np.asarray(out), np.asarray(ref), rtol=1e-5, atol=1e-5)

    print("KERNEL_OK")
</pallas_src>

<mosaic_0001>
module attributes {stable_mosaic.version = 11 : i64} {
  func.func @_blur_kernel(%arg0: i32, %arg1: memref<1x16x16xf32, #tpu.memory_space<vmem>>, %arg2: memref<1x16x16xf32, #tpu.memory_space<vmem>>, %arg3: memref<20x20xf32, #tpu.memory_space<vmem>>) attributes {dimension_semantics = [#tpu.dimension_semantics<parallel>], iteration_bounds = array<i64: 8>, scalar_prefetch = 0 : i64, scratch_operands = 1 : i64, tpu.core_type = #tpu.core_type<tc>, window_params = [{transform_indices = @transform_0, window_bounds = array<i64: 1, 16, 16>}, {transform_indices = @transform_1, window_bounds = array<i64: 1, 16, 16>}]} {
    %c0 = arith.constant 0 : index
    %c0_0 = arith.constant 0 : index
    %c0_1 = arith.constant 0 : index
    %0 = vector.load %arg1[%c0, %c0_0, %c0_1] : memref<1x16x16xf32, #tpu.memory_space<vmem>>, vector<1x16x16xf32>
    %1 = vector.shape_cast %0 : vector<1x16x16xf32> to vector<16x16xf32>
    %c2 = arith.constant 2 : index
    %c2_2 = arith.constant 2 : index
    %2 = vector.load %arg3[%c2, %c2_2] : memref<20x20xf32, #tpu.memory_space<vmem>>, vector<16x16xf32>
    tpu.vector_store %arg3[%c2, %c2_2], %1 {strides = array<i32>} : memref<20x20xf32, #tpu.memory_space<vmem>>, vector<16x16xf32>,
    %c2_3 = arith.constant 2 : index
    %c4 = arith.constant 4 : index
    %3 = vector.load %arg3[%c2_3, %c4] : memref<20x20xf32, #tpu.memory_space<vmem>>, vector<16x1xf32>
    %c2_4 = arith.constant 2 : index
    %c0_5 = arith.constant 0 : index
    %4 = vector.load %arg3[%c2_4, %c0_5] : memref<20x20xf32, #tpu.memory_space<vmem>>, vector<16x1xf32>
    tpu.vector_store %arg3[%c2_4, %c0_5], %3 {strides = array<i32>} : memref<20x20xf32, #tpu.memory_space<vmem>>, vector<16x1xf32>,
    %c2_6 = arith.constant 2 : index
    %c16 = arith.constant 16 : index
    %5 = vector.load %arg3[%c2_6, %c16] : memref<20x20xf32, #tpu.memory_space<vmem>>, vector<16x1xf32>
    %c2_7 = arith.constant 2 : index
    %c18 = arith.constant 18 : index
    %6 = vector.load %arg3[%c2_7, %c18] : memref<20x20xf32, #tpu.memory_space<vmem>>, vector<16x1xf32>
    tpu.vector_store %arg3[%c2_7, %c18], %5 {strides = array<i32>} : memref<20x20xf32, #tpu.memory_space<vmem>>, vector<16x1xf32>,
    %c2_8 = arith.constant 2 : index
    %c3 = arith.constant 3 : index
    %7 = vector.load %arg3[%c2_8, %c3] : memref<20x20xf32, #tpu.memory_space<vmem>>, vector<16x1xf32>
    %c2_9 = arith.constant 2 : index
    %c1 = arith.constant 1 : index
    %8 = vector.load %arg3[%c2_9, %c1] : memref<20x20xf32, #tpu.memory_space<vmem>>, vector<16x1xf32>
    tpu.vector_store %arg3[%c2_9, %c1], %7 {strides = array<i32>} : memref<20x20xf32, #tpu.memory_space<vmem>>, vector<16x1xf32>,
    %c2_10 = arith.constant 2 : index
    %c15 = arith.constant 15 : index
    %9 = vector.load %arg3[%c2_10, %c15] : memref<20x20xf32, #tpu.memory_space<vmem>>, vector<16x1xf32>
    %c2_11 = arith.constant 2 : index
    %c19 = arith.constant 19 : index
    %10 = vector.load %arg3[%c2_11, %c19] : memref<20x20xf32, #tpu.memory_space<vmem>>, vector<16x1xf32>
    tpu.vector_store %arg3[%c2_11, %c19], %9 {strides = array<i32>} : memref<20x20xf32, #tpu.memory_space<vmem>>, vector<16x1xf32>,
    %c4_12 = arith.constant 4 : index
    %c0_13 = arith.constant 0 : index
    %11 = vector.load %arg3[%c4_12, %c0_13] : memref<20x20xf32, #tpu.memory_space<vmem>>, vector<1x20xf32>
    %c0_14 = arith.constant 0 : index
    %c0_15 = arith.constant 0 : index
    %12 = vector.load %arg3[%c0_14, %c0_15] : memref<20x20xf32, #tpu.memory_space<vmem>>, vector<1x20xf32>
    tpu.vector_store %arg3[%c0_14, %c0_15], %11 {strides = array<i32>} : memref<20x20xf32, #tpu.memory_space<vmem>>, vector<1x20xf32>,
    %c16_16 = arith.constant 16 : index
    %c0_17 = arith.constant 0 : index
    %13 = vector.load %arg3[%c16_16, %c0_17] : memref<20x20xf32, #tpu.memory_space<vmem>>, vector<1x20xf32>
    %c18_18 = arith.constant 18 : index
    %c0_19 = arith.constant 0 : index
    %14 = vector.load %arg3[%c18_18, %c0_19] : memref<20x20xf32, #tpu.memory_space<vmem>>, vector<1x20xf32>
    tpu.vector_store %arg3[%c18_18, %c0_19], %13 {strides = array<i32>} : memref<20x20xf32, #tpu.memory_space<vmem>>, vector<1x20xf32>,
    %c3_20 = arith.constant 3 : index
    %c0_21 = arith.constant 0 : index
    %15 = vector.load %arg3[%c3_20, %c0_21] : memref<20x20xf32, #tpu.memory_space<vmem>>, vector<1x20xf32>
    %c1_22 = arith.constant 1 : index
    %c0_23 = arith.constant 0 : index
    %16 = vector.load %arg3[%c1_22, %c0_23] : memref<20x20xf32, #tpu.memory_space<vmem>>, vector<1x20xf32>
    tpu.vector_store %arg3[%c1_22, %c0_23], %15 {strides = array<i32>} : memref<20x20xf32, #tpu.memory_space<vmem>>, vector<1x20xf32>,
    %c15_24 = arith.constant 15 : index
    %c0_25 = arith.constant 0 : index
    %17 = vector.load %arg3[%c15_24, %c0_25] : memref<20x20xf32, #tpu.memory_space<vmem>>, vector<1x20xf32>
    %c19_26 = arith.constant 19 : index
    %c0_27 = arith.constant 0 : index
    %18 = vector.load %arg3[%c19_26, %c0_27] : memref<20x20xf32, #tpu.memory_space<vmem>>, vector<1x20xf32>
    tpu.vector_store %arg3[%c19_26, %c0_27], %17 {strides = array<i32>} : memref<20x20xf32, #tpu.memory_space<vmem>>, vector<1x20xf32>,
    %c0_28 = arith.constant 0 : index
    %c0_29 = arith.constant 0 : index
    %19 = vector.load %arg3[%c0_28, %c0_29] : memref<20x20xf32, #tpu.memory_space<vmem>>, vector<20x16xf32>
    %cst = arith.constant 0.178203255 : f32
    %20 = vector.broadcast %cst : f32 to vector<20x16xf32>
    %21 = arith.mulf %20, %19 : vector<20x16xf32>
    %c0_30 = arith.constant 0 : index
    %c1_31 = arith.constant 1 : index
    %22 = vector.load %arg3[%c0_30, %c1_31] : memref<20x20xf32, #tpu.memory_space<vmem>>, vector<20x16xf32>
    %cst_32 = arith.constant 0.210522279 : f32
    %23 = vector.broadcast %cst_32 : f32 to vector<20x16xf32>
    %24 = arith.mulf %23, %22 : vector<20x16xf32>
    %25 = arith.addf %21, %24 : vector<20x16xf32>
    %c0_33 = arith.constant 0 : index
    %c2_34 = arith.constant 2 : index
    %26 = vector.load %arg3[%c0_33, %c2_34] : memref<20x20xf32, #tpu.memory_space<vmem>>, vector<20x16xf32>
    %cst_35 = arith.constant 0.222548932 : f32
    %27 = vector.broadcast %cst_35 : f32 to vector<20x16xf32>
    %28 = arith.mulf %27, %26 : vector<20x16xf32>
    %29 = arith.addf %25, %28 : vector<20x16xf32>
    %c0_36 = arith.constant 0 : index
    %c3_37 = arith.constant 3 : index
    %30 = vector.load %arg3[%c0_36, %c3_37] : memref<20x20xf32, #tpu.memory_space<vmem>>, vector<20x16xf32>
    %cst_38 = arith.constant 0.210522279 : f32
    %31 = vector.broadcast %cst_38 : f32 to vector<20x16xf32>
    %32 = arith.mulf %31, %30 : vector<20x16xf32>
    %33 = arith.addf %29, %32 : vector<20x16xf32>
    %c0_39 = arith.constant 0 : index
    %c4_40 = arith.constant 4 : index
    %34 = vector.load %arg3[%c0_39, %c4_40] : memref<20x20xf32, #tpu.memory_space<vmem>>, vector<20x16xf32>
    %cst_41 = arith.constant 0.178203255 : f32
    %35 = vector.broadcast %cst_41 : f32 to vector<20x16xf32>
    %36 = arith.mulf %35, %34 : vector<20x16xf32>
    %37 = arith.addf %33, %36 : vector<20x16xf32>
    %38 = vector.extract_strided_slice %37 {offsets = [0, 0], sizes = [16, 16], strides = [1, 1]} : vector<20x16xf32> to vector<16x16xf32>
    %cst_42 = arith.constant 0.178203255 : f32
    %39 = vector.broadcast %cst_42 : f32 to vector<16x16xf32>
    %40 = arith.mulf %39, %38 : vector<16x16xf32>
    %41 = vector.extract_strided_slice %37 {offsets = [1, 0], sizes = [16, 16], strides = [1, 1]} : vector<20x16xf32> to vector<16x16xf32>
    %cst_43 = arith.constant 0.210522279 : f32
    %42 = vector.broadcast %cst_43 : f32 to vector<16x16xf32>
    %43 = arith.mulf %42, %41 : vector<16x16xf32>
    %44 = arith.addf %40, %43 : vector<16x16xf32>
    %45 = vector.extract_strided_slice %37 {offsets = [2, 0], sizes = [16, 16], strides = [1, 1]} : vector<20x16xf32> to vector<16x16xf32>
    %cst_44 = arith.constant 0.222548932 : f32
    %46 = vector.broadcast %cst_44 : f32 to vector<16x16xf32>
    %47 = arith.mulf %46, %45 : vector<16x16xf32>
    %48 = arith.addf %44, %47 : vector<16x16xf32>
    %49 = vector.extract_strided_slice %37 {offsets = [3, 0], sizes = [16, 16], strides = [1, 1]} : vector<20x16xf32> to vector<16x16xf32>
    %cst_45 = arith.constant 0.210522279 : f32
    %50 = vector.broadcast %cst_45 : f32 to vector<16x16xf32>
    %51 = arith.mulf %50, %49 : vector<16x16xf32>
    %52 = arith.addf %48, %51 : vector<16x16xf32>
    %53 = vector.extract_strided_slice %37 {offsets = [4, 0], sizes = [16, 16], strides = [1, 1]} : vector<20x16xf32> to vector<16x16xf32>
    %cst_46 = arith.constant 0.178203255 : f32
    %54 = vector.broadcast %cst_46 : f32 to vector<16x16xf32>
    %55 = arith.mulf %54, %53 : vector<16x16xf32>
    %56 = arith.addf %52, %55 : vector<16x16xf32>
    %c0_47 = arith.constant 0 : index
    %c0_48 = arith.constant 0 : index
    %c0_49 = arith.constant 0 : index
    %57 = vector.load %arg2[%c0_47, %c0_48, %c0_49] : memref<1x16x16xf32, #tpu.memory_space<vmem>>, vector<1x16x16xf32>
    %58 = vector.shape_cast %57 : vector<1x16x16xf32> to vector<16x16xf32>
    %59 = vector.shape_cast %56 : vector<16x16xf32> to vector<1x16x16xf32>
    tpu.vector_store %arg2[%c0_47, %c0_48, %c0_49], %59 {strides = array<i32>} : memref<1x16x16xf32, #tpu.memory_space<vmem>>, vector<1x16x16xf32>,
    return
  }
  func.func @transform_0(%arg0: i32) -> (i32, i32, i32) {
    %c0_i32 = arith.constant 0 : i32
    %c0_i32_0 = arith.constant 0 : i32
    %c0_i32_1 = arith.constant 0 : i32
    return %arg0, %c0_i32, %c0_i32_0 : i32, i32, i32
  }
  func.func @transform_1(%arg0: i32) -> (i32, i32, i32) {
    %c0_i32 = arith.constant 0 : i32
    %c0_i32_0 = arith.constant 0 : i32
    %c0_i32_1 = arith.constant 0 : i32
    return %arg0, %c0_i32, %c0_i32_0 : i32, i32, i32
  }
}

</mosaic_0001>

<bundles_post_ra>
// kernel: tpu_custom_call.1
= control target key start
LH: loop header
LB: loop body
LE: loop exit
PB: predicated region body
PF: predicated region fallthrough
CT: control target
= control target key end

     0   :  { %6 = vsyncpa [#allocation4], 0  ;;  %s800_s0 = inlined_call_operand.hbm [shape: f32[8,16,16], index: 0, kind: input, shape index: {}]   ;;  %s801_s1 = inlined_call_operand.hbm [shape: f32[8,16,16], index: 1, kind: output, shape index: {}]  }
   0x1   :  { %8 = vsyncpa [#allocation4 + $0x1], 0 }
   0x2   :  { %9 = vsyncpa [#allocation5], 0 }
   0x3   :  { %11 = vsyncpa [#allocation5 + $0x1], 0  ;;  %s618_s6 = smov 0   ;;  %s620_s7 = smov 0  }
   0x4   :  { %s622_s8 = smov 0   ;;  %s624_s9 = smov 0  }
   0x5 LB: > { %s639_s10 = sadd.s32 4294967295, %s594_s9   ;;  %s426_s11 = sadd.s32 4294967294, %s594_s9   ;;  %s594_s9 = sphi %s624_s9, %s813_s9   ;;  %s590_s8 = sphi %s622_s8, %s812_s8   ;;  %s586_s7 = sphi %s620_s7, %s811_s7   ;;  %s582_s6 = sphi %s618_s6, %s810_s6  }
   0x6   : > { %s643_s12 = sadd.s32 1, %s594_s9   ;;  %s24_s13 = sadd.s32 1, %s590_s8 }
   0x7   : > { %s21_s14 = ssub.s32 %s594_s9, %s643_s12  ;;  %p31_p0 = scmp.ne.s32.totalorder %s590_s8, %s586_s7 }
   0x8   : > { %p22_p1 = scmp.eq.s32.totalorder %s21_s14, 0  ;;  %p32_p2 = scmp.eq.s32.totalorder %s594_s9, 0 }
   0x9   : > { %p37_p3 = scmp.ne.s32.totalorder %s586_s7, %s582_s6  ;;  %p38_p4 = scmp.eq.s32.totalorder %s639_s10, 0 }
   0xa   : > { %s655_s15 = scalar_select %p22_p1, %s590_s8, %s24_s13  }
   0xb   : > { %p657_p5 = por %p32_p2, %p31_p0  ;;  %p661_p6 = por %p38_p4, %p37_p3 }
   0xc   : > { %p61_p7 = scmp.eq.s32.totalorder %s639_s10, 7  ;;  %p67_p8 = scmp.eq.s32.totalorder %s426_s11, 7 }
   0xd   : > { %p454_p9 = scmp.lt.s32.totalorder %s594_s9, 8  ;;  %s87_s20 = sand.u32 1, %s590_s8  }
   0xe   : > { %p667_p10 = por %p61_p7, %p31_p0  ;;  %p671_p11 = por %p67_p8, %p37_p3 }
   0xf   : > { %s440_s21 = sshll.u32 %s594_s9, 8  ;;  %s429_s22 = sshll.u32 %s87_s20, 4 }
  0x10   : > { %s805_s18 = scalar_select %p667_p10, 1, 0 }
  0x11   : > { %s806_s19 = scalar_select %p671_p11, 1, 0 }
  0x12   : > { %s680_s25 = scalar_lea.hbm %s800_s0, %s440_s21  ;;  %s91_s26 = scalar_lea.vmem [#allocation3], %s429_s22 }
  0x13   : > { %s98_s27 = sshll.u32 %s91_s26, 4  ;;  %p684_p12 = pnand %p454_p9, %p657_p5  ;;  %s688_s27 = int_to_ptr.vmem [resolvable:$true] %s98_s27 }
  0x14   : > { %s690_s29 = scalar_lea.sflag [#allocation4], %s87_s20  ;;  %s498_s30 = scalar_lea.hbm %s680_s25, 256 }
  0x15   : > { %p499_p13 = scmp.ne.s32.totalorder %s680_s25, %s498_s30  ;;  %p500_p0 = pneg %p684_p12 }
  0x16   : > { %s503_s4 = scalar_lea.hbm %s800_s0, 2048  ;;  %p504_p3 = scmp.lt.u32.totalorder %s680_s25, %s800_s0 }
  0x17   : > { %p501_p1 = pnand %p500_p0, %p499_p13  ;;  %p505_p4 = scmp.lt.u32.totalorder %s503_s4, %s498_s30 }
  0x18   : > { %p507_p7 = scmp.lt.u32.totalorder %s498_s30, %s680_s25 }
  0x19   : > { %p502_p2 = pneg %p501_p1  ;;  %p506_p5 = por %p505_p4, %p504_p3 }
  0x1b   : > { %p508_p8 = por %p507_p7, %p506_p5 }
  0x1d   : > { %p509_p9 = pnand %p508_p8, %p502_p2 }
  0x1f   : > { %512 = shalt.err (!%p509_p9)
}
  0x20   : > { %s513_s13 = scalar_lea.vmem %s688_s27, 256  ;;  %s596_s14 = smov [#allocation3]  }
  0x21   : > { %p514_p13 = scmp.ne.s32.totalorder %s688_s27, %s513_s13  ;;  %s518_s16 = sshll.u32 %s596_s14, 4  ;;  %s519_s16 = int_to_ptr.vmem [resolvable:$false] %s518_s16 }
  0x22   : > { %s520_s20 = scalar_lea.vmem %s519_s16, 512  ;;  %p521_p10 = scmp.lt.s32.totalorder %s688_s27, %s519_s16 }
  0x23   : > { %p516_p1 = pnand %p514_p13, %p500_p0  ;;  %p522_p3 = scmp.lt.s32.totalorder %s520_s20, %s513_s13 }
  0x25   : > { %p517_p11 = pneg %p516_p1  ;;  %p523_p4 = por %p522_p3, %p521_p10 }
  0x27   : > { %p524_p5 = pnand %p523_p4, %p517_p11 }
  0x29   : > { %527 = shalt.err (!%p524_p5)
}
  0x2a   : > { %s597_s21 = smov 128   ;;  %s598_s22 = smov 8  }
  0x2b   : > { %449 = dma.hbm_to_vmem [thread:$0]  (!%p684_p12), %s680_s25, 256, %s688_s27, %s690_s29, %s597_s21, %s597_s21, %s598_s22  }
  0x2c   : > { %p432_p0 = scmp.ge.s32.totalorder %s594_s9, 1  ;;  %p106_p2 = scmp.lt.s32.totalorder %s594_s9, 9 }
  0x2e   : > { %p107_p7 = pnand %p432_p0, %p106_p2 }
  0x2f   : > { %s721_s23 = sand.u32 (!%p107_p7), 1, %s586_s7  }
  0x30   : > { %110 = sbr.rel (%p107_p7) target bundleno = 844 (0x34c), region = 24  ;;  %s433_s24 = sshll.u32 (!%p107_p7), %s721_s23, 4 }
  0x31   : > { %s113_s26 = scalar_lea.sflag (!%p107_p7), [#allocation4], %s721_s23  ;;  %s116_s30 = scalar_lea.vmem (!%p107_p7), [#allocation3], %s433_s24 }
  0x37   : > { %573 = dma.done.wait (%p661_p6), %s113_s26, 256  }
  0x38   : > { %575 = vsyncadd (%p661_p6), %s113_s26, 4294967040  ;;  %v135_v0 = vld [vmem:[%s116_s30] sm:$0xff]  ;;  %s599_s25 = smov 2   ;;  %v136_v1 = vld [vmem:[%s116_s30 + $0x8] sm:$0xff]  ;;  %vm145_vm0 = vcmask 146448   ;;  %s600_s27 = smov 124  }
  0x39   : > { %139 = vrot.lane.b32.xlu0 %v135_v0, %s599_s25  ;;  %vm158_vm1 = vcmask 7168   ;;  %vm171_vm2 = vcmask 154768   ;;  %s601_s17 = smov 126   ;;  %vm184_vm3 = vcmask 15368   ;;  %s602_s28 = smov 4   ;;  %vm197_vm4 = vcmask 162968  }
  0x3a   : > { %vm201_vm5 = vcmask 155648   ;;  %s603_s29 = smov 127   ;;  %s604_s2 = smov 125   ;;  %vm286_vm6 = vcmask 1046528   ;;  %vm302_vm7 = vcmask 1045504   ;;  %vm312_vm8 = vcmask 1044480  }
  0x3b   : > { %vm326_vm9 = vcmask 1043456   ;;  %s441_s3 = sshll.u32 %s639_s10, 8  ;;  %s134_s4 = scalar_lea.vmem [#allocation6], %s433_s24  ;;  %vm336_vm10 = vcmask 130048  }
  0x3c   : > { %s353_s5 = sshll.u32 %s134_s4, 4  ;;  %s755_s14 = scalar_lea.hbm %s801_s1, %s441_s3  ;;  %s757_s5 = int_to_ptr.vmem [resolvable:$true] %s353_s5 }
  0x3d   : > { %141 = vrot.lane.b32.xlu0 %v136_v1, %s599_s25  ;;  %s340_s10 = scalar_lea.sflag [#allocation5], %s721_s23  ;;  %s528_s16 = scalar_lea.vmem %s757_s5, 256 }
  0x3e   : > { %p529_p6 = scmp.ne.s32.totalorder %s757_s5, %s528_s16  ;;  %p808_p10 = scmp.ne.s32.totalorder %s805_s18, 0 }
  0x3f   : > { %s605_s20 = smov [#allocation6]  }
  0x40   : > { %p530_p11 = pnand %p529_p6, %p808_p10  ;;  %s532_s21 = sshll.u32 %s605_s20, 4  ;;  %s533_s21 = int_to_ptr.vmem [resolvable:$false] %s532_s21 }
  0x41   : > { %s534_s22 = scalar_lea.vmem %s533_s21, 512  ;;  %p535_p8 = scmp.lt.s32.totalorder %s757_s5, %s533_s21 }
  0x42   : > { %p531_p12 = pneg %p530_p11  ;;  %p536_p9 = scmp.lt.s32.totalorder %s534_s22, %s528_s16 }
  0x44   : > { %p537_p13 = por %p536_p9, %p535_p8 }
  0x46   : > { %p538_p1 = pnand %p537_p13, %p531_p12 }
  0xab   : > { %v140_v2 = vpop.permute.xlu0 %139 }
  0xac   : > { %146 = vst.msk [vmem:[#allocation2 + $0x2] sm:$0xff] %vm145_vm0, %v140_v2 }
  0xaf   : > { %v142_v3 = vpop.permute.xlu0 %141 }
  0xb0   : > { %147 = vst.msk [vmem:[#allocation2 + $0xa] sm:$0xff] %vm145_vm0, %v142_v3 }
  0xb3   : > { %v148_v4 = vld [vmem:[#allocation2 + $0x2] sm:$0xff] }
  0xb4   : > { %152 = vrot.lane.b32.xlu1 %v148_v4, %s600_s27 }
  0xb7   : > { %v149_v5 = vld [vmem:[#allocation2 + $0xa] sm:$0xff] }
  0xb8   : > { %154 = vrot.lane.b32.xlu1 %v149_v5, %s600_s27 }
 0x126   : > { %v153_v6 = vpop.permute.xlu1 %152 }
 0x127   : > { %159 = vst.msk [vmem:[#allocation2 + $0x2] sm:$0xff] %vm158_vm1, %v153_v6 }
 0x12a   : > { %v155_v7 = vpop.permute.xlu1 %154 }
 0x12b   : > { %160 = vst.msk [vmem:[#allocation2 + $0xa] sm:$0xff] %vm158_vm1, %v155_v7 }
 0x12e   : > { %v161_v8 = vld [vmem:[#allocation2 + $0x2] sm:$0xff] }
 0x12f   : > { %165 = vrot.lane.b32.xlu0 %v161_v8, %s599_s25 }
 0x132   : > { %v162_v9 = vld [vmem:[#allocation2 + $0xa] sm:$0xff] }
 0x133   : > { %167 = vrot.lane.b32.xlu1 %v162_v9, %s599_s25 }
 0x1a1   : > { %v166_v10 = vpop.permute.xlu0 %165 }
 0x1a2   : > { %172 = vst.msk [vmem:[#allocation2 + $0x2] sm:$0xff] %vm171_vm2, %v166_v10 }
 0x1a5   : > { %v168_v11 = vpop.permute.xlu1 %167 }
 0x1a6   : > { %173 = vst.msk [vmem:[#allocation2 + $0xa] sm:$0xff] %vm171_vm2, %v168_v11 }
 0x1a9   : > { %v174_v12 = vld [vmem:[#allocation2 + $0x2] sm:$0xff] }
 0x1aa   : > { %178 = vrot.lane.b32.xlu0 %v174_v12, %s601_s17 }
 0x1ad   : > { %v175_v13 = vld [vmem:[#allocation2 + $0xa] sm:$0xff] }
 0x1ae   : > { %180 = vrot.lane.b32.xlu1 %v175_v13, %s601_s17 }
 0x21c   : > { %v179_v14 = vpop.permute.xlu0 %178 }
 0x21d   : > { %185 = vst.msk [vmem:[#allocation2 + $0x2] sm:$0xff] %vm184_vm3, %v179_v14 }
 0x220   : > { %v181_v15 = vpop.permute.xlu1 %180 }
 0x221   : > { %186 = vst.msk [vmem:[#allocation2 + $0xa] sm:$0xff] %vm184_vm3, %v181_v15 }
 0x224   : > { %v187_v16 = vld [vmem:[#allocation2 + $0x2] sm:$0xff] }
 0x225   : > { %191 = vrot.lane.b32.xlu0 %v187_v16, %s602_s28 }
 0x228   : > { %v188_v17 = vld [vmem:[#allocation2 + $0xa] sm:$0xff] }
 0x229   : > { %193 = vrot.lane.b32.xlu1 %v188_v17, %s602_s28 }
 0x297   : > { %v192_v18 = vpop.permute.xlu0 %191 }
 0x298   : > { %198 = vst.msk [vmem:[#allocation2 + $0x2] sm:$0xff] %vm197_vm4, %v192_v18 }
 0x29b   : > { %v194_v19 = vpop.permute.xlu1 %193 }
 0x29c   : > { %199 = vst.msk [vmem:[#allocation2 + $0xa] sm:$0xff] %vm197_vm4, %v194_v19 }
 0x29f   : > { %v200_v20 = vld [vmem:[#allocation2 + $0x4] sm:$0x1]  ;;  %v205_v21 = vld [vmem:[#allocation2 + $0x3] sm:$0x1] }
 0x2a0   : > { %202 = vst.msk [vmem:[#allocation2] sm:$0x1] %vm201_vm5, %v200_v20  ;;  %206 = vst.msk [vmem:[#allocation2 + $0x1] sm:$0x1] %vm201_vm5, %v205_v21 }
 0x2a3   : > { %v203_v22 = vld [vmem:[#allocation2 + $0x10] sm:$0x1]  ;;  %v207_v23 = vld [vmem:[#allocation2 + $0xf] sm:$0x1] }
 0x2a4   : > { %v210_v24 = vld [vmem:[#allocation2 + $0x8] sm:$0xff]  ;;  %204 = vst.msk [vmem:[#allocation2 + $0x12] sm:$0x1] %vm201_vm5, %v203_v22  ;;  %208 = vst.msk [vmem:[#allocation2 + $0x13] sm:$0x1] %vm201_vm5, %v207_v23 }
 0x2a5   : > { %v234_v25 = vmul.f32 0.22254893, %v210_v24  ;;  %v216_v26 = vmul.f32 0.21052228, %v210_v24  ;;  %v213_v34 = vmul.f32 0.17820325, %v210_v24 }
 0x2a7   : > { %241 = vrot.lane.b32.xlu0 %v234_v25, %s601_s17  ;;  %223 = vrot.lane.b32.xlu1 %v216_v26, %s603_s29  ;;  %v209_v27 = vld [vmem:[#allocation2] sm:$0xff] }
 0x2a8   : > { %v215_v28 = vmul.f32 0.21052228, %v209_v27  ;;  %v233_v30 = vmul.f32 0.22254893, %v209_v27  ;;  %v212_v33 = vmul.f32 0.17820325, %v209_v27 }
 0x2ab   : > { %253 = vrot.lane.b32.xlu1 %v216_v26, %s604_s2  ;;  %221 = vrot.lane.b32.xlu0 %v215_v28, %s603_s29  ;;  %v211_v29 = vld [vmem:[#allocation2 + $0x10] sm:$0xf] }
 0x2ac   : > { %v217_v31 = vmul.f32 0.21052228, %v211_v29  ;;  %v235_v32 = vmul.f32 0.22254893, %v211_v29  ;;  %v214_v35 = vmul.f32 0.17820325, %v211_v29 }
 0x2af   : > { %239 = vrot.lane.b32.xlu1 %v233_v30, %s601_s17  ;;  %225 = vrot.lane.b32.xlu0 %v217_v31, %s603_s29 }
 0x2b3   : > { %243 = vrot.lane.b32.xlu1 %v235_v32, %s601_s17  ;;  %251 = vrot.lane.b32.xlu0 %v215_v28, %s604_s2 }
 0x2b7   : > { %255 = vrot.lane.b32.xlu0 %v217_v31, %s604_s2  ;;  %266 = vrot.lane.b32.xlu1 %v212_v33, %s600_s27 }
 0x2bb   : > { %268 = vrot.lane.b32.xlu0 %v213_v34, %s600_s27  ;;  %270 = vrot.lane.b32.xlu1 %v214_v35, %s600_s27 }
 0x319   : > { %v242_v36 = vpop.permute.xlu0 %241  ;;  %v224_v37 = vpop.permute.xlu1 %223 }
 0x31a   : > { %v231_v42 = vadd.f32 %v224_v37, %v213_v34 }
 0x31c   : > { %v249_v47 = vadd.f32 %v242_v36, %v231_v42 }
 0x31d   : > { %v254_v38 = vpop.permute.xlu1 %253  ;;  %v222_v39 = vpop.permute.xlu0 %221 }
 0x31e   : > { %v230_v43 = vadd.f32 %v222_v39, %v212_v33  ;;  %v261_v54 = vadd.f32 %v254_v38, %v249_v47 }
 0x321   : > { %v240_v40 = vpop.permute.xlu1 %239  ;;  %v226_v41 = vpop.permute.xlu0 %225 }
 0x322   : > { %v248_v46 = vadd.f32 %v240_v40, %v230_v43  ;;  %v232_v48 = vadd.f32 %v226_v41, %v214_v35 }
 0x325   : > { %v244_v44 = vpop.permute.xlu1 %243  ;;  %v252_v45 = vpop.permute.xlu0 %251 }
 0x326   : > { %v260_v49 = vadd.f32 %v252_v45, %v248_v46  ;;  %v250_v52 = vadd.f32 %v244_v44, %v232_v48 }
 0x329   : > { %v256_v50 = vpop.permute.xlu0 %255  ;;  %v267_v51 = vpop.permute.xlu1 %266 }
 0x32a   : > { %v275_v53 = vadd.f32 %v267_v51, %v260_v49  ;;  %v262_v55 = vadd.f32 %v256_v50, %v250_v52 }
 0x32c   : > { %v280_v58 = vmul.f32 0.21052228, %v275_v53  ;;  %v296_v61 = vmul.f32 0.22254893, %v275_v53  ;;  %v278_v6 = vmul.f32 0.17820325, %v275_v53 }
 0x32d   : > { %v269_v56 = vpop.permute.xlu0 %268  ;;  %v271_v57 = vpop.permute.xlu1 %270 }
 0x32e   : > { %v276_v59 = vadd.f32 %v269_v56, %v261_v54  ;;  %v277_v60 = vadd.f32 %v271_v57, %v262_v55  ;;  %v287_v2 = vrot.slane %v280_v58, 1  ;;  %v303_v10 = vrot.slane %v296_v61, 2 }
 0x32f   : > { %v313_v16 = vrot.slane %v280_v58, 3  ;;  %v327_v23 = vrot.slane %v278_v6, 4 }
 0x330   : > { %v281_v62 = vmul.f32 0.21052228, %v276_v59  ;;  %v297_v63 = vmul.f32 0.22254893, %v276_v59  ;;  %v282_v0 = vmul.f32 0.21052228, %v277_v60 }
 0x331   : > { %v298_v1 = vmul.f32 0.22254893, %v277_v60  ;;  %v279_v3 = vmul.f32 0.17820325, %v276_v59  ;;  %v322_v9 = vmul.f32 0.17820325, %v277_v60 }
 0x332   : > { %v288_v4 = vrot.slane %v281_v62, 1  ;;  %v304_v5 = vrot.slane %v297_v63, 2  ;;  %v290_v7 = vrot.slane %v282_v0, 1  ;;  %v314_v12 = vrot.slane %v281_v62, 3 }
 0x333   : > { %v306_v8 = vrot.slane %v298_v1, 2  ;;  %v316_v15 = vrot.slane %v282_v0, 3  ;;  %v328_v18 = vrot.slane %v279_v3, 4  ;;  %v330_v22 = vrot.slane %v322_v9, 4 }
 0x334   : > { %v289_v11 = vsel %vm286_vm6, %v287_v2, %v288_v4  ;;  %v291_v14 = vsel %vm286_vm6, %v288_v4, %v290_v7  ;;  %v305_v17 = vsel %vm302_vm7, %v303_v10, %v304_v5  ;;  %v315_v24 = vsel %vm312_vm8, %v313_v16, %v314_v12 }
 0x335   : > { %v294_v13 = vadd.f32 %v289_v11, %v278_v6  ;;  %v295_v19 = vadd.f32 %v291_v14, %v279_v3  ;;  %v307_v21 = vsel %vm302_vm7, %v304_v5, %v306_v8  ;;  %v317_v27 = vsel %vm312_vm8, %v314_v12, %v316_v15 }
 0x336   : > { %v329_v28 = vsel %vm326_vm9, %v327_v23, %v328_v18  ;;  %v331_v31 = vsel %vm326_vm9, %v328_v18, %v330_v22 }
 0x337   : > { %v310_v20 = vadd.f32 %v305_v17, %v294_v13  ;;  %v311_v25 = vadd.f32 %v307_v21, %v295_v19 }
 0x339   : > { %v320_v26 = vadd.f32 %v315_v24, %v310_v20  ;;  %v321_v29 = vadd.f32 %v317_v27, %v311_v25 }
 0x33b   : > { %v334_v30 = vadd.f32 %v329_v28, %v320_v26  ;;  %v335_v32 = vadd.f32 %v331_v31, %v321_v29 }
 0x33d   : > { %337 = vst.msk [vmem:[%s134_s4] sm:$0xff] %vm336_vm10, %v334_v30  ;;  %338 = vst.msk [vmem:[%s134_s4 + $0x8] sm:$0xff] %vm336_vm10, %v335_v32 }
 0x33e   : > { %541 = shalt.err (!%p538_p1)
}
 0x33f   : > { %s542_s24 = scalar_lea.hbm %s755_s14, 256  ;;  %s546_s25 = scalar_lea.hbm %s801_s1, 2048 }
 0x340   : > { %p543_p3 = scmp.ne.s32.totalorder %s755_s14, %s542_s24  ;;  %p547_p0 = scmp.lt.u32.totalorder %s755_s14, %s801_s1 }
 0x341   : > { %p548_p2 = scmp.lt.u32.totalorder %s546_s25, %s542_s24  ;;  %p550_p6 = scmp.lt.u32.totalorder %s542_s24, %s755_s14 }
 0x342   : > { %p544_p4 = pnand %p543_p3, %p808_p10 }
 0x343   : > { %p549_p7 = por %p548_p2, %p547_p0 }
 0x344   : > { %p545_p5 = pneg %p544_p4 }
 0x345   : > { %p551_p11 = por %p550_p6, %p549_p7 }
 0x347   : > { %p552_p12 = pnand %p551_p11, %p545_p5 }
 0x349   : > { %555 = shalt.err (!%p552_p12)
}
 0x34a   : > { %s606_s28 = smov 128   ;;  %s607_s29 = smov 8  }
 0x34b   : > { %444 = dma.vmem_to_hbm [thread:$0]  (%p808_p10), %s757_s5, 256, %s755_s14, %s340_s10, %s606_s28, %s606_s28, %s607_s29  }
 0x34c PF: > { %p455_p8 = scmp.ge.s32.totalorder %s594_s9, 2  ;;  %s368_s2 = sand.u32 1, %s582_s6  }
 0x34d   : > { %p809_p9 = scmp.ne.s32.totalorder %s806_s19, 0  ;;  %s369_s3 = scalar_lea.sflag [#allocation5], %s368_s2 }
 0x34f   : > { %p451_p13 = pnand %p455_p8, %p809_p9 }
 0x351   : > { %577 = dma.done.wait (!%p451_p13), %s369_s3, 256  }
 0x352   : > { %579 = vsyncadd (!%p451_p13), %s369_s3, 4294967040  ;;  %p14_p1 = scmp.ge.s32.totalorder %s643_s12, 10   ;;  %s810_s6 = smov %s586_s7 }
 0x353   : > { %s811_s7 = smov %s590_s8  ;;  %s812_s8 = smov %s655_s15 }
 0x354   : > { %s813_s9 = smov %s643_s12  ;;  %16 = sbr.rel (!%p14_p1) target bundleno = 5 (0x5), region = 69 }
 0x35b   :  { %374 = vsyncpa [#allocation4], 1 }
 0x35c   :  { %376 = vsyncpa [#allocation4 + $0x1], 1 }
 0x35d   :  { %377 = vsyncpa [#allocation5], 1 }
 0x35e   :  { %379 = vsyncpa [#allocation5 + $0x1], 1 }

</bundles_post_ra>
